<compile_context>
chip_gen: v6e
topology: v6e:2x2x1
jax: 0.10.0
libtpu: 0.0.40
codegen_flags: <defaults>
</compile_context>

<pallas_src>
import functools

import jax
import jax.numpy as jnp
from jax.experimental import pallas as pl
from jax.experimental.pallas import tpu as pltpu


def _round_up(x, m):
    return ((x + m - 1) // m) * m


def _vmem_budget_bytes():
    """Per-core VMEM budget: physical capacity minus headroom, capped at 100 MiB."""
    phys = None
    try:
        info = pltpu.get_tpu_info()
        phys = getattr(info, "vmem_capacity_bytes", None)
    except Exception:
        phys = None
    if not phys:
        phys = 64 * 1024 * 1024  # conservative fallback (v7x per-core VMEM)
    return int(max(min(phys - 8 * 1024 * 1024, 100 * 1024 * 1024), 32 * 1024 * 1024))


# ----------------------------------------------------------------------------
# Kernels
# ----------------------------------------------------------------------------
def _adaptor_kernel_resident(x_ref, w1_ref, b1_ref, w2_ref, b2_ref, o_ref):
    # Both weights resident (single-buffered); one grid step does the whole row tile.
    h = jnp.dot(x_ref[...], w1_ref[...], preferred_element_type=jnp.float32)
    h = h + b1_ref[...]
    h = h * jax.nn.sigmoid(h)                       # SiLU in f32 (EUP slot)
    out = jnp.dot(h.astype(w2_ref.dtype), w2_ref[...],
                  preferred_element_type=jnp.float32)
    o_ref[...] = (out + b2_ref[...]).astype(o_ref.dtype)


def _adaptor_kernel_tiled(x_ref, w1_ref, b1_ref, w2_ref, b2_ref, o_ref, h_ref):
    # W2 column-tiled along grid axis j; h = SiLU(x@W1+b1) computed once per
    # row tile (j == 0) into a persistent VMEM scratch and reused for all j.
    @pl.when(pl.program_id(1) == 0)
    def _():
        h = jnp.dot(x_ref[...], w1_ref[...], preferred_element_type=jnp.float32)
        h = h + b1_ref[...]
        h = h * jax.nn.sigmoid(h)
        h_ref[...] = h.astype(h_ref.dtype)

    out = jnp.dot(h_ref[...], w2_ref[...], preferred_element_type=jnp.float32)
    o_ref[...] = (out + b2_ref[...]).astype(o_ref.dtype)


# ----------------------------------------------------------------------------
# One-time weight preparation (hoisted out of the per-call hot path)
# ----------------------------------------------------------------------------
def prepare_adaptor_params(w1, b1, w2, b2, *, compute_dtype=jnp.bfloat16,
                           mode="auto", tn=512):
    """Cast, pad (lane-dense multiples of 128) and optionally pack W2 once."""
    E, D = w1.shape
    E_pad = max(_round_up(E, 128), 128)
    D_pad = max(_round_up(D, 128), 128)
    c_isize = jnp.dtype(compute_dtype).itemsize

    w1c = jnp.pad(w1.astype(compute_dtype), ((0, E_pad - E), (0, D_pad - D)))
    w2c = jnp.pad(w2.astype(compute_dtype), ((0, D_pad - D), (0, D_pad - D)))
    b1f = jnp.pad(b1.astype(jnp.float32).reshape(1, D), ((0, 0), (0, D_pad - D)))
    b2f = jnp.pad(b2.astype(jnp.float32).reshape(1, D), ((0, 0), (0, D_pad - D)))

    if mode == "auto":
        weight_bytes = (E_pad * D_pad + D_pad * D_pad) * c_isize + 2 * D_pad * 4
        # Conservative per-step streaming estimate (tm = 256 rows, f32 out + f32 h temp).
        stream_bytes = 2 * 256 * E_pad * c_isize + 4 * 256 * D_pad * 4
        mode = "resident" if weight_bytes + stream_bytes <= _vmem_budget_bytes() else "tiled"

    if mode == "tiled":
        # Column tile over D_pad: multiple of 128 that divides D_pad.
        tn_eff = min(max(tn, 128), D_pad)
        tn_eff = (tn_eff // 128) * 128
        while D_pad % tn_eff:
            tn_eff -= 128
        num_j = D_pad // tn_eff
        # Pre-pack W2 into contiguous (num_j, D_pad, tn) tiles: each grid step's
        # W2 DMA is one dense read instead of D_pad strided segments.
        w2c = jnp.transpose(w2c.reshape(D_pad, num_j, tn_eff), (1, 0, 2))

    return {"w1": w1c, "b1": b1f, "w2": w2c, "b2": b2f, "D": D, "mode": mode}


# ----------------------------------------------------------------------------
# Forward pass
# ----------------------------------------------------------------------------
@functools.partial(jax.jit, static_argnames=("tm", "orig_D"))
def _adaptor_forward(image_features, w1c, b1f, w2c, b2f, *, tm, orig_D):
    B, S, E = image_features.shape
    E_pad, D_pad = w1c.shape
    compute_dtype = w1c.dtype
    out_dtype = image_features.dtype
    tiled = (w2c.ndim == 3)
    c_isize = jnp.dtype(compute_dtype).itemsize
    o_isize = jnp.dtype(out_dtype).itemsize

    M = B * S
    # Row alignment matching sub-32-bit sublane packing: 8 (f32), 16 (bf16), 32 (fp8).
    row_align = 8 * max(1, 4 // c_isize)
    M_pad = max(_round_up(M, row_align), row_align)

    x2d = image_features.reshape(M, E).astype(compute_dtype)
    if E_pad != E or M_pad != M:
        x2d = jnp.pad(x2d, ((0, M_pad - M), (0, E_pad - E)))

    # Row tile: aligned to row_align; keep >= 2 M-tiles when possible (megacore).
    tm_eff = min(tm, M_pad)
    tm_eff = max(row_align, (tm_eff // row_align) * row_align)
    if pl.cdiv(M_pad, tm_eff) < 2 and M_pad > row_align:
        tm_eff = max(row_align, _round_up(pl.cdiv(M_pad, 2), row_align))
    num_i = pl.cdiv(M_pad, tm_eff)

    vmem_limit = _vmem_budget_bytes()

    if not tiled:
        grid = (num_i,)
        in_specs = [
            pl.BlockSpec((tm_eff, E_pad), lambda i: (i, 0)),
            pl.BlockSpec((E_pad, D_pad), lambda i: (0, 0),
                         pipeline_mode=pl.Buffered(1)),
            pl.BlockSpec((1, D_pad), lambda i: (0, 0),
                         pipeline_mode=pl.Buffered(1)),
            pl.BlockSpec((D_pad, D_pad), lambda i: (0, 0),
                         pipeline_mode=pl.Buffered(1)),
            pl.BlockSpec((1, D_pad), lambda i: (0, 0),
                         pipeline_mode=pl.Buffered(1)),
        ]
        out_specs = pl.BlockSpec((tm_eff, D_pad), lambda i: (i, 0))
        scratch_shapes = []
        kernel = _adaptor_kernel_resident
        dim_sem = ("parallel",)
        w2_stream_bytes = D_pad * D_pad * c_isize
    else:
        num_j, _, tn_eff = w2c.shape
        grid = (num_i, num_j)
        in_specs = [
            pl.BlockSpec((tm_eff, E_pad), lambda i, j: (i, 0)),
            pl.BlockSpec((E_pad, D_pad), lambda i, j: (0, 0),
                         pipeline_mode=pl.Buffered(1)),
            pl.BlockSpec((1, D_pad), lambda i, j: (0, 0),
                         pipeline_mode=pl.Buffered(1)),
            # Contiguous pre-packed W2 column tile.
            pl.BlockSpec((pl.Squeezed(), D_pad, tn_eff), lambda i, j: (j, 0, 0)),
            pl.BlockSpec((1, tn_eff), lambda i, j: (0, j)),
        ]
        out_specs = pl.BlockSpec((tm_eff, tn_eff), lambda i, j: (i, j))
        scratch_shapes = [pltpu.VMEM((tm_eff, D_pad), compute_dtype)]
        kernel = _adaptor_kernel_tiled
        dim_sem = ("parallel", "arbitrary")
        # W2 is re-streamed once per row tile while the j axis exists.
        w2_stream_bytes = num_i * D_pad * D_pad * c_isize

    cost = pl.CostEstimate(
        flops=2 * M_pad * E_pad * D_pad + 2 * M_pad * D_pad * D_pad,
        transcendentals=M_pad * D_pad,
        bytes_accessed=(M_pad * E_pad * c_isize          # x read (compute dtype)
                        + E_pad * D_pad * c_isize        # W1
                        + w2_stream_bytes                # W2 (re-streamed if tiled)
                        + 2 * D_pad * 4                  # biases (f32)
                        + M_pad * D_pad * o_isize),      # output write
    )

    out2d = pl.pallas_call(
        kernel,
        out_shape=jax.ShapeDtypeStruct((M_pad, D_pad), out_dtype),
        grid_spec=pltpu.PrefetchScalarGridSpec(
            num_scalar_prefetch=0,
            grid=grid,
            in_specs=in_specs,
            out_specs=out_specs,
            scratch_shapes=scratch_shapes,
        ),
        compiler_params=pltpu.CompilerParams(
            dimension_semantics=dim_sem,
            vmem_limit_bytes=vmem_limit),
        cost_estimate=cost,
    )(x2d, w1c, b1f, w2c, b2f)

    out2d = out2d[:M, :orig_D]
    return out2d.reshape(B, S, orig_D)


def vision_language_adaptor(image_features, params, *, tm=256):
    """Hot-path call; `params` comes from prepare_adaptor_params (called once)."""
    return _adaptor_forward(image_features, params["w1"], params["b1"],
                            params["w2"], params["b2"],
                            tm=tm, orig_D=params["D"])


# ----------------------------------------------------------------------------
# Pure-JAX reference
# ----------------------------------------------------------------------------
def _reference(image_features, w1, b1, w2, b2, compute_dtype=None):
    """If compute_dtype is given, emulate the kernel's reduced-precision matmul
    operands (f32 accumulation, f32 bias add and SiLU)."""
    if compute_dtype is None:
        x, w1r, w2r = image_features, w1, w2
    else:
        x = image_features.astype(compute_dtype)
        w1r = w1.astype(compute_dtype)
        w2r = w2.astype(compute_dtype)
    h = jnp.einsum("bse,ed->bsd", x, w1r,
                   preferred_element_type=jnp.float32) + b1.astype(jnp.float32)
    h = h * jax.nn.sigmoid(h)
    if compute_dtype is not None:
        h = h.astype(compute_dtype)
    out = jnp.einsum("bsd,df->bsf", h, w2r,
                     preferred_element_type=jnp.float32) + b2.astype(jnp.float32)
    return out.astype(image_features.dtype)


if __name__ == "__main__":
    key = jax.random.PRNGKey(0)
    ks = jax.random.split(key, 10)

    # Small config consistent with the module:
    #   encoder_hidden_size = 32, decoder_hidden_size = 32, batch = 2, seq = 8
    B, S, E, D = 2, 8, 32, 32
    x = jax.random.normal(ks[0], (B, S, E), dtype=jnp.float32)
    bound1, bound2 = 1.0 / (E ** 0.5), 1.0 / (D ** 0.5)
    w1 = jax.random.uniform(ks[1], (E, D), jnp.float32, -bound1, bound1)
    b1 = jax.random.uniform(ks[2], (D,), jnp.float32, -bound1, bound1)
    w2 = jax.random.uniform(ks[3], (D, D), jnp.float32, -bound2, bound2)
    b2 = jax.random.uniform(ks[4], (D,), jnp.float32, -bound2, bound2)

    # 1) f32 compute path (resident, 1-D grid): tight check vs f32 reference.
    p_f32 = prepare_adaptor_params(w1, b1, w2, b2, compute_dtype=jnp.float32)
    assert p_f32["mode"] == "resident"
    out_f32 = jax.block_until_ready(vision_language_adaptor(x, p_f32))
    ref_f32 = _reference(x, w1, b1, w2, b2, compute_dtype=None)
    assert out_f32.shape == (B, S, D)
    assert jnp.allclose(out_f32, ref_f32, atol=1e-4, rtol=1e-4), "f32 mismatch"

    # 2) bf16 matmul path (performance default): check vs bf16-emulating reference.
    p_bf16 = prepare_adaptor_params(w1, b1, w2, b2, compute_dtype=jnp.bfloat16)
    out_bf16 = jax.block_until_ready(vision_language_adaptor(x, p_bf16))
    ref_bf16 = _reference(x, w1, b1, w2, b2, compute_dtype=jnp.bfloat16)
    assert jnp.allclose(out_bf16, ref_bf16, atol=1e-2, rtol=1e-2), "bf16 mismatch"

    # 3) Larger lane-dense shape exercising both grid structures:
    #    resident (W1+W2 in VMEM) vs forced-tiled (packed W2 column tiles, h scratch).
    B2, S2, E2, D2 = 2, 64, 256, 512
    xb = jax.random.normal(ks[5], (B2, S2, E2), dtype=jnp.float32)
    bb1, bb2 = 1.0 / (E2 ** 0.5), 1.0 / (D2 ** 0.5)
    w1b = jax.random.uniform(ks[6], (E2, D2), jnp.float32, -bb1, bb1)
    b1b = jax.random.uniform(ks[7], (D2,), jnp.float32, -bb1, bb1)
    w2b = jax.random.uniform(ks[8], (D2, D2), jnp.float32, -bb2, bb2)
    b2b = jax.random.uniform(ks[9], (D2,), jnp.float32, -bb2, bb2)
    ref_big = _reference(xb, w1b, b1b, w2b, b2b, compute_dtype=jnp.bfloat16)

    p_res = prepare_adaptor_params(w1b, b1b, w2b, b2b,
                                   compute_dtype=jnp.bfloat16, mode="resident")
    out_res = jax.block_until_ready(vision_language_adaptor(xb, p_res))
    assert out_res.shape == (B2, S2, D2)
    assert jnp.allclose(out_res, ref_big, atol=2e-2, rtol=2e-2), "resident big mismatch"

    p_til = prepare_adaptor_params(w1b, b1b, w2b, b2b,
                                   compute_dtype=jnp.bfloat16, mode="tiled", tn=128)
    out_til = jax.block_until_ready(vision_language_adaptor(xb, p_til))
    assert jnp.allclose(out_til, ref_big, atol=2e-2, rtol=2e-2), "tiled big mismatch"
    assert jnp.allclose(out_til, out_res, atol=1e-4, rtol=1e-4), "resident vs tiled mismatch"

    print("KERNEL_OK")
</pallas_src>

<mosaic_0001>
module attributes {stable_mosaic.version = 11 : i64} {
  func.func @_adaptor_kernel_resident(%arg0: i32, %arg1: memref<8x128xf32, #tpu.memory_space<vmem>>, %arg2: memref<128x128xf32, #tpu.memory_space<vmem>>, %arg3: memref<1x128xf32, #tpu.memory_space<vmem>>, %arg4: memref<128x128xf32, #tpu.memory_space<vmem>>, %arg5: memref<1x128xf32, #tpu.memory_space<vmem>>, %arg6: memref<8x128xf32, #tpu.memory_space<vmem>>) attributes {dimension_semantics = [#tpu.dimension_semantics<parallel>], iteration_bounds = array<i64: 2>, scalar_prefetch = 0 : i64, scratch_operands = 0 : i64, tpu.core_type = #tpu.core_type<tc>, window_params = [{transform_indices = @transform_0, window_bounds = array<i64: 8, 128>}, {pipeline_mode = #tpu.pipeline_mode<synchronous>, transform_indices = @transform_1, window_bounds = array<i64: 128, 128>}, {pipeline_mode = #tpu.pipeline_mode<synchronous>, transform_indices = @transform_2, window_bounds = array<i64: 1, 128>}, {pipeline_mode = #tpu.pipeline_mode<synchronous>, transform_indices = @transform_3, window_bounds = array<i64: 128, 128>}, {pipeline_mode = #tpu.pipeline_mode<synchronous>, transform_indices = @transform_4, window_bounds = array<i64: 1, 128>}, {transform_indices = @transform_5, window_bounds = array<i64: 8, 128>}]} {
    %c0 = arith.constant 0 : index
    %c0_0 = arith.constant 0 : index
    %0 = vector.load %arg1[%c0, %c0_0] : memref<8x128xf32, #tpu.memory_space<vmem>>, vector<8x128xf32>
    %c0_1 = arith.constant 0 : index
    %c0_2 = arith.constant 0 : index
    %1 = vector.load %arg2[%c0_1, %c0_2] : memref<128x128xf32, #tpu.memory_space<vmem>>, vector<128x128xf32>
    %cst = arith.constant dense<0.000000e+00> : vector<8x128xf32>
    %2 = tpu.matmul %0, %1, %cst {dimension_numbers = #tpu.dot_dimension_numbers<[1], [0], [0], [1], [0, 0, 1, 1], [], []>} : vector<8x128xf32>, vector<128x128xf32>, vector<8x128xf32> -> vector<8x128xf32>
    %c0_3 = arith.constant 0 : index
    %c0_4 = arith.constant 0 : index
    %3 = vector.load %arg3[%c0_3, %c0_4] : memref<1x128xf32, #tpu.memory_space<vmem>>, vector<1x128xf32>
    %4 = vector.broadcast %3 : vector<1x128xf32> to vector<8x128xf32>
    %5 = arith.addf %2, %4 : vector<8x128xf32>
    %6 = arith.negf %5 : vector<8x128xf32>
    %7 = math.exp %6 : vector<8x128xf32>
    %cst_5 = arith.constant 1.000000e+00 : f32
    %8 = vector.broadcast %cst_5 : f32 to vector<8x128xf32>
    %9 = arith.addf %8, %7 : vector<8x128xf32>
    %10 = arith.divf %8, %9 : vector<8x128xf32>
    %11 = arith.mulf %5, %10 : vector<8x128xf32>
    %c0_6 = arith.constant 0 : index
    %c0_7 = arith.constant 0 : index
    %12 = vector.load %arg4[%c0_6, %c0_7] : memref<128x128xf32, #tpu.memory_space<vmem>>, vector<128x128xf32>
    %cst_8 = arith.constant dense<0.000000e+00> : vector<8x128xf32>
    %13 = tpu.matmul %11, %12, %cst_8 {dimension_numbers = #tpu.dot_dimension_numbers<[1], [0], [0], [1], [0, 0, 1, 1], [], []>} : vector<8x128xf32>, vector<128x128xf32>, vector<8x128xf32> -> vector<8x128xf32>
    %c0_9 = arith.constant 0 : index
    %c0_10 = arith.constant 0 : index
    %14 = vector.load %arg5[%c0_9, %c0_10] : memref<1x128xf32, #tpu.memory_space<vmem>>, vector<1x128xf32>
    %15 = vector.broadcast %14 : vector<1x128xf32> to vector<8x128xf32>
    %16 = arith.addf %13, %15 : vector<8x128xf32>
    %c0_11 = arith.constant 0 : index
    %c0_12 = arith.constant 0 : index
    %17 = vector.load %arg6[%c0_11, %c0_12] : memref<8x128xf32, #tpu.memory_space<vmem>>, vector<8x128xf32>
    tpu.vector_store %arg6[%c0_11, %c0_12], %16 {strides = array<i32>} : memref<8x128xf32, #tpu.memory_space<vmem>>, vector<8x128xf32>,
    return
  }
  func.func @transform_0(%arg0: i32) -> (i32, i32) {
    %c0_i32 = arith.constant 0 : i32
    %c0_i32_0 = arith.constant 0 : i32
    return %arg0, %c0_i32 : i32, i32
  }
  func.func @transform_1(%arg0: i32) -> (i32, i32) {
    %c0_i32 = arith.constant 0 : i32
    %c0_i32_0 = arith.constant 0 : i32
    %c0_i32_1 = arith.constant 0 : i32
    return %c0_i32, %c0_i32_0 : i32, i32
  }
  func.func @transform_2(%arg0: i32) -> (i32, i32) {
    %c0_i32 = arith.constant 0 : i32
    %c0_i32_0 = arith.constant 0 : i32
    %c0_i32_1 = arith.constant 0 : i32
    return %c0_i32, %c0_i32_0 : i32, i32
  }
  func.func @transform_3(%arg0: i32) -> (i32, i32) {
    %c0_i32 = arith.constant 0 : i32
    %c0_i32_0 = arith.constant 0 : i32
    %c0_i32_1 = arith.constant 0 : i32
    return %c0_i32, %c0_i32_0 : i32, i32
  }
  func.func @transform_4(%arg0: i32) -> (i32, i32) {
    %c0_i32 = arith.constant 0 : i32
    %c0_i32_0 = arith.constant 0 : i32
    %c0_i32_1 = arith.constant 0 : i32
    return %c0_i32, %c0_i32_0 : i32, i32
  }
  func.func @transform_5(%arg0: i32) -> (i32, i32) {
    %c0_i32 = arith.constant 0 : i32
    %c0_i32_0 = arith.constant 0 : i32
    return %arg0, %c0_i32 : i32, i32
  }
}

</mosaic_0001>

<bundles_post_ra>
// kernel: _adaptor_forward.1
= control target key start
LH: loop header
LB: loop body
LE: loop exit
PB: predicated region body
PF: predicated region fallthrough
CT: control target
= control target key end

     0   :  { %10 = vsyncpa [#allocation3], 0  ;;  %s890_s0 = inlined_call_operand.vmem [shape: f32[16,128], index: 0, kind: input, shape index: {}]   ;;  %s891_s1 = inlined_call_operand.hbm [shape: f32[128,128], index: 1, kind: input, shape index: {}]   ;;  %s892_s2 = inlined_call_operand.vmem [shape: f32[1,128], index: 2, kind: input, shape index: {}]   ;;  %s893_s3 = inlined_call_operand.hbm [shape: f32[128,128], index: 3, kind: input, shape index: {}]   ;;  %s894_s4 = inlined_call_operand.vmem [shape: f32[1,128], index: 4, kind: input, shape index: {}]   ;;  %s895_s5 = inlined_call_operand.vmem [shape: f32[16,128], index: 5, kind: output, shape index: {}]  }
   0x1   :  { %11 = vsyncpa [#allocation5], 0  ;;  %s781_s18 = smov 0  }
   0x2 LB: > { %s787_s19 = sadd.s32 4294967295, %s743_s18   ;;  %p522_p0 = scmp.ge.s32.totalorder %s743_s18, 1  ;;  %s743_s18 = sphi %s781_s18, %s17_s18  }
   0x3   : > { %p158_p1 = scmp.lt.s32.totalorder %s743_s18, 3  ;;  %s745_s20 = smov [#allocation2]  }
   0x4   : > { %s170_s21 = sshll.u32 %s745_s20, 4  ;;  %p655_p3 = scmp.eq.s32.totalorder %s787_s19, 0  ;;  %s171_s21 = int_to_ptr.vmem [resolvable:$true] %s170_s21 }
   0x5   : > { %p791_p2 = pnand %p522_p0, %p158_p1  ;;  %s746_s23 = smov [#allocation4]  }
   0x6   : > { %s186_s24 = sshll.u32 %s746_s23, 4  ;;  %s688_s26 = scalar_lea.vmem %s171_s21, 2048  ;;  %s187_s24 = int_to_ptr.vmem [resolvable:$true] %s186_s24 }
   0x7   : > { %p648_p4 = pneg %p791_p2  ;;  %p689_p7 = scmp.ne.s32.totalorder %s171_s21, %s688_s26 }
   0x8   : > { %p696_p10 = scmp.lt.s32.totalorder %s171_s21, %s171_s21  ;;  %p697_p11 = scmp.lt.s32.totalorder %s688_s26, %s688_s26 }
   0x9   : > { %p800_p5 = pnand %p655_p3, %p648_p4 }
   0xa   : > { %p698_p12 = por %p697_p11, %p696_p10 }
   0xb   : > { %p679_p6 = pneg %p800_p5 }
   0xd   : > { %p691_p8 = pnand %p689_p7, %p679_p6 }
   0xf   : > { %p692_p9 = pneg %p691_p8 }
  0x11   : > { %p699_p13 = pnand %p698_p12, %p692_p9 }
  0x13   : > { %702 = shalt.err (!%p699_p13)
}
  0x14   : > { %s747_s27 = smov 128   ;;  %s748_s28 = smov 8  }
  0x15   : > { %651 = dma.hbm_to_vmem [thread:$0]  (!%p800_p5), %s891_s1, 2048, %s171_s21, [#allocation3], %s747_s27, %s747_s27, %s748_s28  }
  0x16   : > { %s714_s6 = scalar_lea.vmem %s187_s24, 2048  ;;  %p722_p7 = scmp.lt.s32.totalorder %s187_s24, %s187_s24 }
  0x17   : > { %p715_p0 = scmp.ne.s32.totalorder %s187_s24, %s714_s6  ;;  %p723_p8 = scmp.lt.s32.totalorder %s714_s6, %s714_s6 }
  0x19   : > { %p717_p1 = pnand %p715_p0, %p679_p6  ;;  %p724_p10 = por %p723_p8, %p722_p7 }
  0x1b   : > { %p718_p4 = pneg %p717_p1 }
  0x1d   : > { %p725_p9 = pnand %p724_p10, %p718_p4 }
  0x1f   : > { %728 = shalt.err (!%p725_p9)
}
  0x20   : > { %654 = dma.hbm_to_vmem [thread:$0]  (!%p800_p5), %s893_s3, 2048, %s187_s24, [#allocation5], %s747_s27, %s747_s27, %s748_s28  }
  0x21   : > { %212 = sbr.rel (%p791_p2) target bundleno = 500 (0x1f4), region = 40 }
  0x26   : > { %734 = dma.done.wait (%p655_p3), [#allocation3], 2048  }
  0x27   : > { %736 = vsyncadd (%p655_p3), [#allocation3], 4294965248 }
  0x28   : > { %738 = dma.done.wait (%p655_p3), [#allocation5], 2048  }
  0x29   : > { %740 = vsyncadd (%p655_p3), [#allocation5], 4294965248  ;;  %v749_v0 = vmov 0.0   ;;  %vm750_vm0 = vmmov 0   ;;  %v266_v1 = vld [vmem:[#allocation2 + $0x78] sm:$0xff]  ;;  %v265_v2 = vld [vmem:[#allocation2 + $0x70] sm:$0xff] }
  0x2a   : > { %570 = vmatprep.subr.mxu0 %v749_v0  ;;  %602 = vmatprep.mubr.msk.f32.mxu0 %vm750_vm0, %v749_v0  ;;  %v264_v3 = vld [vmem:[#allocation2 + $0x68] sm:$0xff]  ;;  %v263_v4 = vld [vmem:[#allocation2 + $0x60] sm:$0xff]  ;;  %v262_v5 = vld [vmem:[#allocation2 + $0x58] sm:$0xff]  ;;  %p242_p2 = scmp.lt.s32.totalorder %s787_s19, 1 }
  0x2b   : > { %605 = vmatprep.subr.mxu1 %v749_v0  ;;  %637 = vmatprep.mubr.msk.f32.mxu1 %vm750_vm0, %v749_v0  ;;  %v261_v6 = vld [vmem:[#allocation2 + $0x50] sm:$0xff]  ;;  %v260_v7 = vld [vmem:[#allocation2 + $0x48] sm:$0xff]  ;;  %v259_v8 = vld [vmem:[#allocation2 + $0x40] sm:$0xff] }
  0x2c   : > { %571 = vmatpush3.msra.mxu0 %v266_v1  ;;  %v258_v9 = vld [vmem:[#allocation2 + $0x38] sm:$0xff]  ;;  %v257_v10 = vld [vmem:[#allocation2 + $0x30] sm:$0xff]  ;;  %v256_v11 = vld [vmem:[#allocation2 + $0x28] sm:$0xff]  ;;  %s899_s19 = smov (!%p242_p2, %s787_s19), 1 }
  0x2d   : > { %572 = vmatprep.subr.mxu0 %v749_v0  ;;  %v255_v12 = vld [vmem:[#allocation2 + $0x20] sm:$0xff]  ;;  %v254_v13 = vld [vmem:[#allocation2 + $0x18] sm:$0xff]  ;;  %s529_s9 = sshll.u32 %s899_s19, 3  ;;  %v253_v14 = vld [vmem:[#allocation2 + $0x10] sm:$0xff] }
  0x2e   : > { %573 = vmatpush3.msra.mxu0 %v265_v2  ;;  %v252_v15 = vld [vmem:[#allocation2 + $0x8] sm:$0xff]  ;;  %s245_s12 = scalar_lea.vmem %s890_s0, %s529_s9  ;;  %v251_v16 = vld [vmem:[#allocation2] sm:$0xff]  ;;  %v366_v18 = vld [vmem:[#allocation4 + $0x78] sm:$0xff]  ;;  %s249_s21 = scalar_lea.vmem %s895_s5, %s529_s9 }
  0x2f   : > { %574 = vmatprep.subr.mxu0 %v749_v0  ;;  %v250_v17 = vld [vmem:[%s245_s12] sm:$0xff]  ;;  %606 = vmatpush3.msra.mxu1 %v366_v18  ;;  %v365_v19 = vld [vmem:[#allocation4 + $0x70] sm:$0xff]  ;;  %v364_v20 = vld [vmem:[#allocation4 + $0x68] sm:$0xff] }
  0x30   : > { %575 = vmatpush3.msra.mxu0 %v264_v3  ;;  %607 = vmatprep.subr.mxu1 %v749_v0  ;;  %v363_v21 = vld [vmem:[#allocation4 + $0x60] sm:$0xff]  ;;  %v362_v22 = vld [vmem:[#allocation4 + $0x58] sm:$0xff]  ;;  %v361_v23 = vld [vmem:[#allocation4 + $0x50] sm:$0xff] }
  0x31   : > { %576 = vmatprep.subr.mxu0 %v749_v0  ;;  %608 = vmatpush3.msra.mxu1 %v365_v19  ;;  %v360_v24 = vld [vmem:[#allocation4 + $0x48] sm:$0xff]  ;;  %v359_v25 = vld [vmem:[#allocation4 + $0x40] sm:$0xff]  ;;  %v358_v26 = vld [vmem:[#allocation4 + $0x38] sm:$0xff] }
  0x32   : > { %577 = vmatpush3.msra.mxu0 %v263_v4  ;;  %609 = vmatprep.subr.mxu1 %v749_v0  ;;  %v357_v27 = vld [vmem:[#allocation4 + $0x30] sm:$0xff]  ;;  %v356_v28 = vld [vmem:[#allocation4 + $0x28] sm:$0xff]  ;;  %v355_v29 = vld [vmem:[#allocation4 + $0x20] sm:$0xff] }
  0x33   : > { %578 = vmatprep.subr.mxu0 %v749_v0  ;;  %610 = vmatpush3.msra.mxu1 %v364_v20  ;;  %v354_v30 = vld [vmem:[#allocation4 + $0x18] sm:$0xff]  ;;  %v353_v31 = vld [vmem:[#allocation4 + $0x10] sm:$0xff]  ;;  %v352_v32 = vld [vmem:[#allocation4 + $0x8] sm:$0xff] }
  0x34   : > { %579 = vmatpush3.msra.mxu0 %v262_v5  ;;  %611 = vmatprep.subr.mxu1 %v749_v0  ;;  %v351_v33 = vld [vmem:[#allocation4] sm:$0xff] }
  0x35   : > { %580 = vmatprep.subr.mxu0 %v749_v0  ;;  %612 = vmatpush3.msra.mxu1 %v363_v21  ;;  %v531_v34 = vld [vmem:[%s892_s2] ss:$0 sm:$0xff] }
  0x36   : > { %581 = vmatpush3.msra.mxu0 %v261_v6  ;;  %613 = vmatprep.subr.mxu1 %v749_v0  ;;  %v533_v43 = vld [vmem:[%s894_s4] ss:$0 sm:$0xff] }
  0x37   : > { %582 = vmatprep.subr.mxu0 %v749_v0  ;;  %614 = vmatpush3.msra.mxu1 %v362_v22 }
  0x38   : > { %583 = vmatpush3.msra.mxu0 %v260_v7  ;;  %615 = vmatprep.subr.mxu1 %v749_v0 }
  0x39   : > { %584 = vmatprep.subr.mxu0 %v749_v0  ;;  %616 = vmatpush3.msra.mxu1 %v361_v23 }
  0x3a   : > { %585 = vmatpush3.msra.mxu0 %v259_v8  ;;  %617 = vmatprep.subr.mxu1 %v749_v0 }
  0x3b   : > { %586 = vmatprep.subr.mxu0 %v749_v0  ;;  %618 = vmatpush3.msra.mxu1 %v360_v24 }
  0x3c   : > { %587 = vmatpush3.msra.mxu0 %v258_v9  ;;  %619 = vmatprep.subr.mxu1 %v749_v0 }
  0x3d   : > { %588 = vmatprep.subr.mxu0 %v749_v0  ;;  %620 = vmatpush3.msra.mxu1 %v359_v25 }
  0x3e   : > { %589 = vmatpush3.msra.mxu0 %v257_v10  ;;  %621 = vmatprep.subr.mxu1 %v749_v0 }
  0x3f   : > { %590 = vmatprep.subr.mxu0 %v749_v0  ;;  %622 = vmatpush3.msra.mxu1 %v358_v26 }
  0x40   : > { %591 = vmatpush3.msra.mxu0 %v256_v11  ;;  %623 = vmatprep.subr.mxu1 %v749_v0 }
  0x41   : > { %592 = vmatprep.subr.mxu0 %v749_v0  ;;  %624 = vmatpush3.msra.mxu1 %v357_v27 }
  0x42   : > { %593 = vmatpush3.msra.mxu0 %v255_v12  ;;  %625 = vmatprep.subr.mxu1 %v749_v0 }
  0x43   : > { %594 = vmatprep.subr.mxu0 %v749_v0  ;;  %626 = vmatpush3.msra.mxu1 %v356_v28 }
  0x44   : > { %595 = vmatpush3.msra.mxu0 %v254_v13  ;;  %627 = vmatprep.subr.mxu1 %v749_v0 }
  0x45   : > { %596 = vmatprep.subr.mxu0 %v749_v0  ;;  %628 = vmatpush3.msra.mxu1 %v355_v29 }
  0x46   : > { %597 = vmatpush3.msra.mxu0 %v253_v14  ;;  %629 = vmatprep.subr.mxu1 %v749_v0 }
  0x47   : > { %598 = vmatprep.subr.mxu0 %v749_v0  ;;  %630 = vmatpush3.msra.mxu1 %v354_v30 }
  0x48   : > { %599 = vmatpush3.msra.mxu0 %v252_v15  ;;  %631 = vmatprep.subr.mxu1 %v749_v0 }
  0x49   : > { %600 = vmatprep.subr.mxu0 %v749_v0  ;;  %632 = vmatpush3.msra.mxu1 %v353_v31 }
  0x4a   : > { %601 = vmatpush3.msra.mxu0 %v251_v16  ;;  %633 = vmatprep.subr.mxu1 %v749_v0 }
  0x4b   : > { %603 = vmatmul.mubr.f32.vlgmr.msra.gmra.mxu0 %v250_v17  ;;  %634 = vmatpush3.msra.mxu1 %v352_v32 }
  0x4c   : > { %635 = vmatprep.subr.mxu1 %v749_v0 }
  0x4d   : > { %636 = vmatpush3.msra.mxu1 %v351_v33 }
 0x10b   : > { %v340_v35 = vpop.f32.mrf.mxu0 }
 0x10c   : > { %v341_v36 = vadd.f32 %v531_v34, %v340_v35 }
 0x10d   : > { %v604_v37 = vpop.f32.mrf.mxu0 }
 0x10e   : > { %v532_v38 = vmul.f32 -1.442695, %v341_v36 }
 0x110   : > { %673 = vpow2.f32 %v532_v38 }
 0x11d   : > { %v674_v39 = vpop.eup %673 }
 0x11e   : > { %v347_v40 = vadd.f32 1.0, %v674_v39 }
 0x120   : > { %675 = vrcp.f32 %v347_v40 }
 0x12d   : > { %v676_v41 = vpop.eup %675 }
 0x12e   : > { %v350_v42 = vmul.f32 %v676_v41, %v341_v36 }
 0x130   : > { %638 = vmatmul.mubr.f32.vlgmr.msra.gmra.mxu1 %v350_v42 }
 0x1f0   : > { %v440_v44 = vpop.f32.mrf.mxu1 }
 0x1f1   : > { %v441_v45 = vadd.f32 %v533_v43, %v440_v44 }
 0x1f2   : > { %v639_v46 = vpop.f32.mrf.mxu1 }
 0x1f3   : > { %444 = vst [vmem:[%s249_s21] sm:$0xff] %v441_v45 }
 0x1f4 PF: > { %s17_s18 = sadd.s32 1, %s743_s18  }
 0x1f5   : > { %p14_p3 = scmp.ge.s32.totalorder %s17_s18, 4  }
 0x1f7   :  { %16 = sbr.rel (!%p14_p3) target bundleno = 2 (0x2), region = 79 }
 0x1fc   :  { %464 = vsyncpa [#allocation3], 1 }
 0x1fd   :  { %466 = vsyncpa [#allocation3 + $0x1], 1 }
 0x1fe   :  { %467 = vsyncpa [#allocation5], 1 }

</bundles_post_ra>
